<compile_context>
chip_gen: v6e
topology: v6e:2x2x1
jax: 0.10.0
libtpu: 0.0.40
codegen_flags: <defaults>
</compile_context>

<pallas_src>
import jax
import jax.numpy as jnp
from jax.experimental import pallas as pl
from jax.experimental.pallas import tpu as pltpu


def logreg_kernel(x_ref, w_ref, b_ref, o_ref):
    # Cast f32 activations to bf16 only here (keeps HBM traffic at 4 B/elem
    # instead of 8 B/elem with a host pre-pass); MXU accumulates in f32.
    x_bf16 = x_ref[...].astype(jnp.bfloat16)
    logits = jnp.dot(x_bf16, w_ref[...],
                     preferred_element_type=jnp.float32) + b_ref[...]
    # Numerically stable log-softmax; padded classes carry bias -1e30 so their
    # exp() underflows to 0 and they don't perturb the normalizer.
    m = jnp.max(logits, axis=-1, keepdims=True)
    shifted = logits - m
    lse = jnp.log(jnp.sum(jnp.exp(shifted), axis=-1, keepdims=True))
    o_ref[...] = (shifted - lse).astype(o_ref.dtype)


def _round_up(x, m):
    return ((x + m - 1) // m) * m


def _cdiv(a, b):
    return (a + b - 1) // b


def _pick_batch_tile(B, tb):
    """Balanced batch tile: multiple of 16 (8 for tiny batches), never larger
    than the batch (only the last tile can be ragged), and >=2 tiles when the
    batch is big enough so both v7x TensorCores get work."""
    granule = 16 if B >= 16 else 8
    if B <= granule:
        return B                       # block == full array dim (always legal)
    min_tiles = 2 if B >= 2 * granule else 1
    num_tiles = max(_cdiv(B, tb), min_tiles)
    TB = _round_up(_cdiv(B, num_tiles), granule)
    # Keep TB <= B so at most the last tile is ragged (standard boundary case).
    return min(TB, (B // granule) * granule)


def _vmem_limit_bytes(TB, D, C_pad):
    x_bufs = 2 * TB * D * 4                 # f32 x block, double-buffered
    o_bufs = 2 * TB * C_pad * 4             # f32 out block, double-buffered
    w_buf = 2 * D * C_pad * 2               # bf16 W (constant index_map)
    b_buf = 2 * 8 * 128 * 4                 # padded bias
    temps = TB * D * 2 + 4 * TB * C_pad * 4  # in-kernel bf16 x copy + f32 temps
    est = x_bufs + o_bufs + w_buf + b_buf + temps
    return int(min(max(int(est * 1.3) + (2 << 20), 24 << 20), 60 << 20))


def logreg_forward(x, w, b, *, tb=2048):
    """Forward pass of LogReg: log_softmax(x @ w + b, axis=-1).

    x: (B, D) float32 (bf16 also accepted), w: (D, C) float32 (transposed vs
    the PyTorch Linear weight), b: (C,) or (1, C).  Returns (B, C) float32
    log-probabilities.
    """
    B, D = x.shape
    Dw, C = w.shape
    assert D == Dw, (D, Dw)

    C_pad = _round_up(max(C, 128), 128)     # 10 -> 128 (lane-dense output)

    # Tiny one-time parameter padding (store W/b pre-padded for real training).
    w_p = jnp.zeros((D, C_pad), jnp.bfloat16).at[:, :C].set(
        w.astype(jnp.bfloat16))
    b_p = jnp.full((1, C_pad), -1e30, jnp.float32).at[:, :C].set(
        b.reshape(1, C).astype(jnp.float32))

    TB = _pick_batch_tile(B, tb)
    grid = (_cdiv(B, TB),)

    cost = pl.CostEstimate(
        flops=2 * B * D * C_pad,
        transcendentals=B * C_pad + B,       # exp per logit + log per row
        bytes_accessed=B * D * 4 + D * C_pad * 2 + C_pad * 4 + B * C_pad * 4,
    )

    out = pl.pallas_call(
        logreg_kernel,
        out_shape=jax.ShapeDtypeStruct((B, C_pad), jnp.float32),
        grid=grid,
        in_specs=[
            pl.BlockSpec((TB, D), lambda i: (i, 0)),      # x: batch-tiled, full 784 width
            pl.BlockSpec((D, C_pad), lambda i: (0, 0)),   # W: VMEM-resident
            pl.BlockSpec((1, C_pad), lambda i: (0, 0)),   # b: VMEM-resident
        ],
        out_specs=pl.BlockSpec((TB, C_pad), lambda i: (i, 0)),
        compiler_params=pltpu.CompilerParams(
            dimension_semantics=("parallel",),
            vmem_limit_bytes=_vmem_limit_bytes(TB, D, C_pad),
        ),
        cost_estimate=cost,
    )(x, w_p, b_p)

    # Drop the padded class columns (a downstream consumer could instead read
    # the padded (B, 128) layout directly and fold this slice away).
    return out[:, :C]


if __name__ == "__main__":
    # Shapes implied by the module: img_dim=(1, 28, 28) -> D=784, num_classes=10.
    B, D, C = 8, 784, 10

    key = jax.random.PRNGKey(0)
    kx, kw, kb = jax.random.split(key, 3)

    # Deterministic params mimicking nn.Linear default init: U(-1/sqrt(D), 1/sqrt(D)).
    bound = 1.0 / (D ** 0.5)
    w = jax.random.uniform(kw, (D, C), jnp.float32, minval=-bound, maxval=bound)
    b = jax.random.uniform(kb, (1, C), jnp.float32, minval=-bound, maxval=bound)
    x = jax.random.normal(kx, (B, D), jnp.float32)

    out = jax.block_until_ready(logreg_forward(x, w, b))

    # Reference in plain f32 JAX; tolerance loosened for the bf16 MXU operands
    # (accumulation and softmax stay f32).
    ref = jax.nn.log_softmax(x @ w + b, axis=1)
    assert out.shape == (B, C)
    assert bool(jnp.allclose(out, ref, atol=3e-2, rtol=3e-2)), (
        float(jnp.max(jnp.abs(out - ref))))

    print("KERNEL_OK")
</pallas_src>

<mosaic_0001>
module attributes {stable_mosaic.version = 11 : i64} {
  func.func @logreg_kernel(%arg0: i32, %arg1: memref<8x784xf32, #tpu.memory_space<vmem>>, %arg2: memref<784x128xbf16, #tpu.memory_space<vmem>>, %arg3: memref<1x128xf32, #tpu.memory_space<vmem>>, %arg4: memref<8x128xf32, #tpu.memory_space<vmem>>) attributes {dimension_semantics = [#tpu.dimension_semantics<parallel>], iteration_bounds = array<i64: 1>, scalar_prefetch = 0 : i64, scratch_operands = 0 : i64, tpu.core_type = #tpu.core_type<tc>, window_params = [{transform_indices = @transform_0, window_bounds = array<i64: 8, 784>}, {pipeline_mode = #tpu.pipeline_mode<synchronous>, transform_indices = @transform_1, window_bounds = array<i64: 784, 128>}, {pipeline_mode = #tpu.pipeline_mode<synchronous>, transform_indices = @transform_2, window_bounds = array<i64: 1, 128>}, {transform_indices = @transform_3, window_bounds = array<i64: 8, 128>}]} {
    %c0 = arith.constant 0 : index
    %c0_0 = arith.constant 0 : index
    %0 = vector.load %arg1[%c0, %c0_0] : memref<8x784xf32, #tpu.memory_space<vmem>>, vector<8x784xf32>
    %1 = arith.truncf %0 : vector<8x784xf32> to vector<8x784xbf16>
    %c0_1 = arith.constant 0 : index
    %c0_2 = arith.constant 0 : index
    %2 = vector.load %arg2[%c0_1, %c0_2] : memref<784x128xbf16, #tpu.memory_space<vmem>>, vector<784x128xbf16>
    %cst = arith.constant dense<0.000000e+00> : vector<8x128xf32>
    %3 = tpu.matmul %1, %2, %cst {dimension_numbers = #tpu.dot_dimension_numbers<[1], [0], [0], [1], [0, 0, 1, 1], [], []>} : vector<8x784xbf16>, vector<784x128xbf16>, vector<8x128xf32> -> vector<8x128xf32>
    %c0_3 = arith.constant 0 : index
    %c0_4 = arith.constant 0 : index
    %4 = vector.load %arg3[%c0_3, %c0_4] : memref<1x128xf32, #tpu.memory_space<vmem>>, vector<1x128xf32>
    %5 = vector.broadcast %4 : vector<1x128xf32> to vector<8x128xf32>
    %6 = arith.addf %3, %5 : vector<8x128xf32>
    %cst_5 = arith.constant dense<0xFF800000> : vector<8xf32>
    %7 = vector.multi_reduction <maximumf>, %6, %cst_5 [1] : vector<8x128xf32> to vector<8xf32>
    %8 = vector.shape_cast %7 : vector<8xf32> to vector<8x1xf32>
    %9 = vector.broadcast %8 : vector<8x1xf32> to vector<8x128xf32>
    %10 = arith.subf %6, %9 : vector<8x128xf32>
    %11 = math.exp %10 : vector<8x128xf32>
    %cst_6 = arith.constant dense<0.000000e+00> : vector<8xf32>
    %12 = vector.multi_reduction <add>, %11, %cst_6 [1] : vector<8x128xf32> to vector<8xf32>
    %13 = vector.shape_cast %12 : vector<8xf32> to vector<8x1xf32>
    %14 = math.log %13 : vector<8x1xf32>
    %15 = vector.broadcast %14 : vector<8x1xf32> to vector<8x128xf32>
    %16 = arith.subf %10, %15 : vector<8x128xf32>
    %c0_7 = arith.constant 0 : index
    %c0_8 = arith.constant 0 : index
    %17 = vector.load %arg4[%c0_7, %c0_8] : memref<8x128xf32, #tpu.memory_space<vmem>>, vector<8x128xf32>
    tpu.vector_store %arg4[%c0_7, %c0_8], %16 {strides = array<i32>} : memref<8x128xf32, #tpu.memory_space<vmem>>, vector<8x128xf32>,
    return
  }
  func.func @transform_0(%arg0: i32) -> (i32, i32) {
    %c0_i32 = arith.constant 0 : i32
    %c0_i32_0 = arith.constant 0 : i32
    return %arg0, %c0_i32 : i32, i32
  }
  func.func @transform_1(%arg0: i32) -> (i32, i32) {
    %c0_i32 = arith.constant 0 : i32
    %c0_i32_0 = arith.constant 0 : i32
    %c0_i32_1 = arith.constant 0 : i32
    return %c0_i32, %c0_i32_0 : i32, i32
  }
  func.func @transform_2(%arg0: i32) -> (i32, i32) {
    %c0_i32 = arith.constant 0 : i32
    %c0_i32_0 = arith.constant 0 : i32
    %c0_i32_1 = arith.constant 0 : i32
    return %c0_i32, %c0_i32_0 : i32, i32
  }
  func.func @transform_3(%arg0: i32) -> (i32, i32) {
    %c0_i32 = arith.constant 0 : i32
    %c0_i32_0 = arith.constant 0 : i32
    return %arg0, %c0_i32 : i32, i32
  }
}

</mosaic_0001>

<bundles_post_ra>
// kernel: tpu_custom_call.1
= control target key start
LH: loop header
LB: loop body
LE: loop exit
PB: predicated region body
PF: predicated region fallthrough
CT: control target
= control target key end

     0   :  { %8 = vsyncpa [#allocation3], 0  ;;  %s936_s0 = inlined_call_operand.hbm [shape: f32[8,784], index: 0, kind: input, shape index: {}]   ;;  %s937_s1 = inlined_call_operand.hbm [shape: bf16[784,128], index: 1, kind: input, shape index: {}]   ;;  %s938_s2 = inlined_call_operand.vmem [shape: f32[1,128], index: 2, kind: input, shape index: {}]   ;;  %s939_s3 = inlined_call_operand.hbm [shape: f32[8,128], index: 3, kind: output, shape index: {}]  }
   0x1   :  { %9 = vsyncpa [#allocation6], 0 }
   0x2   :  { %10 = vsyncpa [#allocation4], 0  ;;  %s897_s12 = smov [#allocation2]   ;;  %s898_s14 = smov [#allocation5]  }
   0x3   :  { %s17_s13 = sshll.u32 %s897_s12, 4  ;;  %s26_s15 = sshll.u32 %s898_s14, 4  ;;  %s18_s13 = int_to_ptr.vmem [resolvable:$true] %s17_s13  ;;  %s27_s15 = int_to_ptr.vmem [resolvable:$true] %s26_s15 }
   0x4   :  { %s839_s16 = scalar_lea.vmem %s18_s13, 896  ;;  %p844_p1 = scmp.lt.s32.totalorder %s18_s13, %s18_s13 }
   0x5   :  { %p840_p0 = scmp.ne.s32.totalorder %s18_s13, %s839_s16  ;;  %p845_p2 = scmp.lt.s32.totalorder %s839_s16, %s839_s16 }
   0x7   :  { %p846_p3 = por %p845_p2, %p844_p1 }
   0x9   :  { %p847_p4 = pnand %p846_p3, %p840_p0 }
   0xb   :  { %850 = shalt.err (!%p847_p4)
}
   0xc   :  { %20 = dma.hbm_to_vmem [thread:$0]  %s936_s0, 896, %s18_s13, [#allocation3]  }
   0xd   :  { %s859_s19 = scalar_lea.vmem %s27_s15, 6272  ;;  %p864_p6 = scmp.lt.s32.totalorder %s27_s15, %s27_s15 }
   0xe   :  { %p860_p5 = scmp.ne.s32.totalorder %s27_s15, %s859_s19  ;;  %p865_p7 = scmp.lt.s32.totalorder %s859_s19, %s859_s19 }
  0x10   :  { %p866_p8 = por %p865_p7, %p864_p6 }
  0x12   :  { %p867_p9 = pnand %p866_p8, %p860_p5 }
  0x14   :  { %870 = shalt.err (!%p867_p9)
}
  0x15   :  { %s899_s20 = smov 64   ;;  %s900_s21 = smov 4  }
  0x16   :  { %32 = dma.hbm_to_vmem [thread:$0]  %s937_s1, 6272, %s27_s15, [#allocation6], %s899_s20, %s899_s20, %s900_s21  }
  0x17   :  { %891 = dma.done.wait [#allocation3], 896  }
  0x18   :  { %892 = vsyncadd [#allocation3], 4294966400 }
  0x19   :  { %893 = dma.done.wait [#allocation6], 6272  }
  0x1a   :  { %894 = vsyncadd [#allocation6], 4294961024  ;;  %v778_v0 = vld [vmem:[#allocation5 + $0x78] sm:$0xff]   ;;  %v782_v4 = vld [vmem:[#allocation5 + $0x70] sm:$0xff]   ;;  %v901_v44 = vmov 0.0   ;;  %vm902_vm0 = vmmov 0  }
  0x1b   :  { %v779_v1 = vld [vmem:[#allocation5 + $0x38] sm:$0xff]   ;;  %697 = vmatprep.subr.bf16.mxu0 %v778_v0  ;;  %v783_v5 = vld [vmem:[#allocation5 + $0x30] sm:$0xff]   ;;  %v786_v8 = vld [vmem:[#allocation5 + $0x68] sm:$0xff]   ;;  %vm455_vm1 = vcmask 130048  }
  0x1c   :  { %v780_v2 = vld [vmem:[#allocation5 + $0xf8] sm:$0xff]   ;;  %698 = vmatpush3.bf16.msra.mxu0 %v779_v1  ;;  %v784_v6 = vld [vmem:[#allocation5 + $0xf0] sm:$0xff]   ;;  %v787_v9 = vld [vmem:[#allocation5 + $0x28] sm:$0xff]  }
  0x1d   :  { %v781_v3 = vld [vmem:[#allocation5 + $0xb8] sm:$0xff]   ;;  %719 = vmatprep.subr.bf16.mxu1 %v780_v2  ;;  %699 = vmatprep.subr.bf16.mxu0 %v782_v4  ;;  %v785_v7 = vld [vmem:[#allocation5 + $0xb0] sm:$0xff]   ;;  %v788_v10 = vld [vmem:[#allocation5 + $0xe8] sm:$0xff]  }
  0x1e   :  { %720 = vmatpush3.bf16.msra.mxu1 %v781_v3  ;;  %v789_v11 = vld [vmem:[#allocation5 + $0xa8] sm:$0xff]   ;;  %v790_v12 = vld [vmem:[#allocation5 + $0x60] sm:$0xff]   ;;  %v794_v16 = vld [vmem:[#allocation5 + $0x58] sm:$0xff]  }
  0x1f   :  { %721 = vmatprep.subr.bf16.mxu1 %v784_v6  ;;  %v791_v13 = vld [vmem:[#allocation5 + $0x20] sm:$0xff]   ;;  %v795_v17 = vld [vmem:[#allocation5 + $0x18] sm:$0xff]   ;;  %v798_v20 = vld [vmem:[#allocation5 + $0x50] sm:$0xff]  }
  0x20   :  { %700 = vmatpush3.bf16.msra.mxu0 %v783_v5  ;;  %v792_v14 = vld [vmem:[#allocation5 + $0xe0] sm:$0xff]   ;;  %v796_v18 = vld [vmem:[#allocation5 + $0xd8] sm:$0xff]   ;;  %v799_v21 = vld [vmem:[#allocation5 + $0x10] sm:$0xff]  }
  0x21   :  { %701 = vmatprep.subr.bf16.mxu0 %v786_v8  ;;  %v793_v15 = vld [vmem:[#allocation5 + $0xa0] sm:$0xff]   ;;  %v797_v19 = vld [vmem:[#allocation5 + $0x98] sm:$0xff]   ;;  %v800_v22 = vld [vmem:[#allocation5 + $0xd0] sm:$0xff]  }
  0x22   :  { %722 = vmatpush3.bf16.msra.mxu1 %v785_v7  ;;  %v801_v23 = vld [vmem:[#allocation5 + $0x90] sm:$0xff]   ;;  %v802_v24 = vld [vmem:[#allocation5 + $0x48] sm:$0xff]   ;;  %v806_v28 = vld [vmem:[#allocation5 + $0x40] sm:$0xff]  }
  0x23   :  { %723 = vmatprep.subr.bf16.mxu1 %v788_v10  ;;  %v803_v25 = vld [vmem:[#allocation5 + $0x8] sm:$0xff]   ;;  %v807_v29 = vld [vmem:[#allocation5] sm:$0xff]   ;;  %v43_v31 = vld [vmem:[#allocation2 + $0x8] sm:$0xff] }
  0x24   :  { %702 = vmatpush3.bf16.msra.mxu0 %v787_v9  ;;  %v804_v26 = vld [vmem:[#allocation5 + $0xc8] sm:$0xff]   ;;  %v808_v30 = vld [vmem:[#allocation5 + $0xc0] sm:$0xff]   ;;  %v50_v32 = vpack.c.bf16 %v43_v31, %v43_v31  ;;  %v810_v36 = vld [vmem:[#allocation5 + $0x178] sm:$0xff]  }
  0x25   :  { %703 = vmatprep.subr.bf16.mxu0 %v790_v12  ;;  %v805_v27 = vld [vmem:[#allocation5 + $0x88] sm:$0xff]   ;;  %v809_v33 = vld [vmem:[#allocation5 + $0x80] sm:$0xff]   ;;  %v811_v39 = vld [vmem:[#allocation5 + $0x138] sm:$0xff]  }
  0x26   :  { %724 = vmatpush3.bf16.msra.mxu1 %v789_v11  ;;  %v42_v34 = vld [vmem:[#allocation2] sm:$0xff]  ;;  %v45_v37 = vld [vmem:[#allocation2 + $0x18] sm:$0xff]  ;;  %491 = vmatprep.mubr.bf16.mxu0 %v50_v32  ;;  %v44_v40 = vld [vmem:[#allocation2 + $0x10] sm:$0xff] }
  0x27   :  { %725 = vmatprep.subr.bf16.mxu1 %v792_v14  ;;  %v49_v35 = vpack.c.bf16 %v42_v34, %v42_v34  ;;  %v52_v38 = vpack.c.bf16 %v45_v37, %v45_v37  ;;  %v51_v41 = vpack.c.bf16 %v44_v40, %v44_v40  ;;  %v812_v42 = vld [vmem:[#allocation5 + $0x170] sm:$0xff]   ;;  %v814_v45 = vld [vmem:[#allocation5 + $0x168] sm:$0xff]   ;;  %v816_v47 = vld [vmem:[#allocation5 + $0x160] sm:$0xff]  }
  0x28   :  { %704 = vmatpush3.bf16.msra.mxu0 %v791_v13  ;;  %v813_v43 = vld [vmem:[#allocation5 + $0x130] sm:$0xff]   ;;  %v815_v46 = vld [vmem:[#allocation5 + $0x128] sm:$0xff]   ;;  %v817_v48 = vld [vmem:[#allocation5 + $0x120] sm:$0xff]  }
  0x29   :  { %705 = vmatprep.subr.bf16.mxu0 %v794_v16  ;;  %531 = vmatprep.mubr.bf16.mxu1 %v52_v38  ;;  %v818_v49 = vld [vmem:[#allocation5 + $0x158] sm:$0xff]   ;;  %v820_v51 = vld [vmem:[#allocation5 + $0x150] sm:$0xff]   ;;  %v826_v52 = vld [vmem:[#allocation5 + $0x180] sm:$0xff]  }
  0x2a   :  { %726 = vmatpush3.bf16.msra.mxu1 %v793_v15  ;;  %v819_v50 = vld [vmem:[#allocation5 + $0x118] sm:$0xff]   ;;  %v47_v53 = vld [vmem:[#allocation2 + $0x28] sm:$0xff]  ;;  %v822_v58 = vld [vmem:[#allocation5 + $0x148] sm:$0xff]  }
  0x2b   :  { %727 = vmatprep.subr.bf16.mxu1 %v796_v18  ;;  %v54_v54 = vpack.c.bf16 %v47_v53, %v47_v53  ;;  %v48_v55 = vld [vmem:[#allocation2 + $0x30] sm:$0xff]  ;;  %v821_v56 = vld [vmem:[#allocation5 + $0x110] sm:$0xff]   ;;  %v823_v59 = vld [vmem:[#allocation5 + $0x108] sm:$0xff]  }
  0x2c   :  { %706 = vmatpush3.bf16.msra.mxu0 %v795_v17  ;;  %v55_v57 = vpack.c.bf16 %v48_v55, %v48_v55  ;;  %v824_v60 = vld [vmem:[#allocation5 + $0x140] sm:$0xff]   ;;  %v46_v62 = vld [vmem:[#allocation2 + $0x20] sm:$0xff] }
  0x2d   :  { %707 = vmatprep.subr.bf16.mxu0 %v798_v20  ;;  %v825_v61 = vld [vmem:[#allocation5 + $0x100] sm:$0xff]   ;;  %v53_v63 = vpack.c.bf16 %v46_v62, %v46_v62  ;;  %v646_v13 = vld [vmem:[%s938_s2] ss:$0 sm:$0xff]  ;;  %s903_s2 = smov [#allocation7]  }
  0x2e   :  { %728 = vmatpush3.bf16.msra.mxu1 %v797_v19  ;;  %s636_s24 = sshll.u32 %s903_s2, 4  ;;  %s637_s24 = int_to_ptr.vmem [resolvable:$true] %s636_s24 }
  0x2f   :  { %729 = vmatprep.subr.bf16.mxu1 %v800_v22  ;;  %s871_s25 = scalar_lea.vmem %s637_s24, 128  ;;  %p876_p11 = scmp.lt.s32.totalorder %s637_s24, %s637_s24 }
  0x30   :  { %708 = vmatpush3.bf16.msra.mxu0 %v799_v21  ;;  %p872_p10 = scmp.ne.s32.totalorder %s637_s24, %s871_s25  ;;  %p877_p12 = scmp.lt.s32.totalorder %s871_s25, %s871_s25 }
  0x31   :  { %709 = vmatprep.subr.bf16.mxu0 %v802_v24 }
  0x32   :  { %730 = vmatpush3.bf16.msra.mxu1 %v801_v23  ;;  %p878_p13 = por %p877_p12, %p876_p11 }
  0x33   :  { %731 = vmatprep.subr.bf16.mxu1 %v804_v26 }
  0x34   :  { %710 = vmatpush3.bf16.msra.mxu0 %v803_v25  ;;  %p879_p0 = pnand %p878_p13, %p872_p10 }
  0x35   :  { %711 = vmatprep.subr.bf16.mxu0 %v806_v28 }
  0x36   :  { %732 = vmatpush3.bf16.msra.mxu1 %v805_v27 }
  0x37   :  { %733 = vmatprep.subr.bf16.mxu1 %v808_v30 }
  0x38   :  { %712 = vmatpush3.bf16.msra.mxu0 %v807_v29 }
  0x39   :  { %741 = vmatprep.subr.bf16.mxu0 %v810_v36 }
  0x3a   :  { %734 = vmatpush3.bf16.msra.mxu1 %v809_v33 }
  0x3b   :  { %492 = vmatmul.mubr.bf16.vlgmr.msra.gmra.mxu0 %v49_v35  ;;  %765 = vmatprep.subr.bf16.mxu1 %v901_v44 }
  0x3c   :  { %742 = vmatpush3.bf16.msra.mxu0 %v811_v39  ;;  %571 = vmatprep.mubr.bf16.mxu0 %v54_v54 }
  0x3d   :  { %532 = vmatmul.mubr.bf16.vlgmr.msra.gmra.mxu1 %v51_v41  ;;  %743 = vmatprep.subr.bf16.mxu0 %v812_v42 }
  0x3e   :  { %767 = vmatprep.mubr.msk.bf16.mxu1 %vm902_vm0, %v901_v44  ;;  %766 = vmatpush3.bf16.msra.mxu1 %v826_v52 }
  0x40   :  { %744 = vmatpush3.bf16.msra.mxu0 %v813_v43 }
  0x41   :  { %745 = vmatprep.subr.bf16.mxu0 %v814_v45 }
  0x44   :  { %746 = vmatpush3.bf16.msra.mxu0 %v815_v46 }
  0x45   :  { %747 = vmatprep.subr.bf16.mxu0 %v816_v47  ;;  %768 = vmatmul.mubr.msk.bf16.vlgmr.msra.gmra.mxu1 %vm455_vm1, %v55_v57 }
  0x48   :  { %748 = vmatpush3.bf16.msra.mxu0 %v817_v48 }
  0x49   :  { %749 = vmatprep.subr.bf16.mxu0 %v818_v49 }
  0x4c   :  { %750 = vmatpush3.bf16.msra.mxu0 %v819_v50 }
  0x4d   :  { %751 = vmatprep.subr.bf16.mxu0 %v820_v51 }
  0x50   :  { %752 = vmatpush3.bf16.msra.mxu0 %v821_v56 }
  0x51   :  { %753 = vmatprep.subr.bf16.mxu0 %v822_v58 }
  0x54   :  { %754 = vmatpush3.bf16.msra.mxu0 %v823_v59 }
  0x55   :  { %755 = vmatprep.subr.bf16.mxu0 %v824_v60 }
  0x58   :  { %756 = vmatpush3.bf16.msra.mxu0 %v825_v61 }
  0x5b   :  { %572 = vmatmul.mubr.bf16.vlgmr.msra.gmra.mxu0 %v53_v63 }
  0xfb   :  { %v713_v0 = vpop.f32.mrf.mxu0 }
  0xfd   :  { %v714_v1 = vpop.f32.mrf.mxu0  ;;  %v735_v2 = vpop.f32.mrf.mxu1 }
  0xfe   :  { %v715_v12 = vadd.f32 %v714_v1, %v713_v0 }
  0xff   :  { %v716_v3 = vpop.f32.mrf.mxu0  ;;  %v736_v4 = vpop.f32.mrf.mxu1 }
 0x100   :  { %v494_v14 = vadd.f32 %v715_v12, %v646_v13  ;;  %v737_v15 = vadd.f32 %v736_v4, %v735_v2 }
 0x101   :  { %v717_v5 = vpop.f32.mrf.mxu0  ;;  %v738_v6 = vpop.f32.mrf.mxu1 }
 0x102   :  { %v534_v18 = vadd.f32 %v737_v15, %v494_v14 }
 0x103   :  { %v739_v7 = vpop.f32.mrf.mxu1 }
 0x105   :  { %v613_v8 = vpop.f32.mrf.mxu1 }
 0x107   :  { %v769_v9 = vpop.f32.mrf.mxu1 }
 0x109   :  { %v616_v10 = vpop.f32.mrf.mxu1 }
 0x10b   :  { %v770_v11 = vpop.f32.mrf.mxu1 }
 0x11b   :  { %v757_v16 = vpop.f32.mrf.mxu0 }
 0x11d   :  { %v758_v17 = vpop.f32.mrf.mxu0 }
 0x11e   :  { %v759_v19 = vadd.f32 %v758_v17, %v757_v16 }
 0x11f   :  { %v760_v20 = vpop.f32.mrf.mxu0 }
 0x120   :  { %v574_v21 = vadd.f32 %v759_v19, %v534_v18 }
 0x121   :  { %v761_v22 = vpop.f32.mrf.mxu0 }
 0x122   :  { %v614_v23 = vadd.f32 %v613_v8, %v574_v21 }
 0x124   :  { %619 = vmax.xlane.f32.xlu0 %v614_v23 }
 0x1ad   :  { %v620_v24 = vpop.xlane.xlu0 %619 }
 0x1ae   :  { %v621_v25 = vsub.f32 %v614_v23, %v620_v24 }
 0x1b0   :  { %v622_v26 = vmul.f32 1.442695, %v621_v25 }
 0x1b2   :  { %827 = vpow2.f32 %v622_v26 }
 0x1bf   :  { %v828_v27 = vpop.eup %827 }
 0x1c0   :  { %624 = vadd.xlane.f32.xlu0 %v828_v27 }
 0x249   :  { %v625_v28 = vpop.xlane.xlu0 %624 }
 0x24a   :  { %829 = vlog2.f32 %v625_v28 }
 0x257   :  { %v830_v29 = vpop.eup %829 }
 0x258   :  { %v627_v30 = vmul.f32 0.6931472, %v830_v29 }
 0x25a   :  { %v628_v31 = vsub.f32 %v621_v25, %v627_v30 }
 0x25c   :  { %629 = vst [vmem:[#allocation7] sm:$0xff] %v628_v31 }
 0x25d   :  { %882 = shalt.err (!%p879_p0)
}
 0x25e   :  { %639 = dma.vmem_to_hbm [thread:$0]  %s637_s24, 128, %s939_s3, [#allocation4]  }
 0x25f   :  { %895 = dma.done.wait [#allocation4], 128  }
 0x260   :  { %896 = vsyncadd [#allocation4], 4294967168 }
 0x261   :  { %643 = vsyncpa [#allocation3], 1 }
 0x262   :  { %644 = vsyncpa [#allocation6], 1 }
 0x263   :  { %645 = vsyncpa [#allocation4], 1 }

</bundles_post_ra>
